<compile_context>
chip_gen: v6e
topology: v6e:2x2x1
jax: 0.10.0
libtpu: 0.0.40
codegen_flags: <defaults>
</compile_context>

<pallas_src>
import functools

import jax
import jax.numpy as jnp
from jax.experimental import pallas as pl
from jax.experimental.pallas import tpu as pltpu


_TILED_MIN_D = 512          # below this, the whole problem is a single resident block
_W_STREAM_BUDGET = 24 << 20  # cap for double-buffered W tiles (v7x 64 MiB VMEM safe)


def _round_up(n, m):
    return (n + m - 1) // m * m


# --------------------------------------------------------------------------
# Single-block kernels (small D; everything resident, grid=()).
# --------------------------------------------------------------------------
def _cg_bn_kernel(x_ref, w_ref, gamma_ref, beta_ref, o_ref):
    # x: (B, D), w: (D_in, D_out) pre-transposed, gamma/beta: (1, D).
    x = x_ref[...].astype(jnp.float32)
    # Linear -- bias dropped: training-mode BN mean subtraction cancels it exactly.
    x_mm = x_ref[...].astype(w_ref.dtype)         # bf16 W -> native bf16 MXU
    x1 = jnp.dot(x_mm, w_ref[...], preferred_element_type=jnp.float32)
    # BatchNorm1d (training mode): batch mean, biased variance, eps=1e-5,
    # affine folded into one fused scale/shift.
    mean = jnp.mean(x1, axis=0, keepdims=True)
    var = jnp.mean(jnp.square(x1 - mean), axis=0, keepdims=True)
    scale = gamma_ref[...].astype(jnp.float32) * jax.lax.rsqrt(var + 1e-5)
    x1 = (x1 - mean) * scale + beta_ref[...].astype(jnp.float32)
    # GLU over cat((x, x1), 1)  ==  x * sigmoid(x1)
    y = x * jax.nn.sigmoid(x1)
    # F.normalize: y / max(||y||, 1e-12)  ==  y * rsqrt(max(sumsq, 1e-24))
    sumsq = jnp.sum(y * y, axis=1, keepdims=True)
    o_ref[...] = (y * jax.lax.rsqrt(jnp.maximum(sumsq, 1e-24))).astype(o_ref.dtype)


def _cg_nobn_kernel(x_ref, w_ref, b_ref, o_ref):
    x = x_ref[...].astype(jnp.float32)
    x_mm = x_ref[...].astype(w_ref.dtype)
    x1 = jnp.dot(x_mm, w_ref[...], preferred_element_type=jnp.float32)
    x1 = x1 + b_ref[...].astype(jnp.float32)
    y = x * jax.nn.sigmoid(x1)
    sumsq = jnp.sum(y * y, axis=1, keepdims=True)
    o_ref[...] = (y * jax.lax.rsqrt(jnp.maximum(sumsq, 1e-24))).astype(o_ref.dtype)


# --------------------------------------------------------------------------
# Column-tiled, single-pass fused kernels (Dp % 128 == 0).
#   Per column tile j: Linear + (BN) + gate on the (B, TN) slice, write the y tile
#   into a resident f32 scratch, accumulate row sum-of-squares; at the last tile
#   normalize and store the whole lane-dense (B, Dp) output.
# --------------------------------------------------------------------------
def _cg_bn_tiled_fused(x_ref, w_ref, gamma_ref, beta_ref, o_ref, y_sc, ss_sc):
    j = pl.program_id(0)
    tn = w_ref.shape[1]
    col = pl.multiple_of(j * tn, 128)

    # Linear (bias dropped: BN mean subtraction cancels it exactly).
    x_mm = x_ref[...].astype(w_ref.dtype)                               # (B, Dp)
    x1 = jnp.dot(x_mm, w_ref[...], preferred_element_type=jnp.float32)  # (B, TN)
    # BN stats are per-feature over the full batch -> local to a column tile.
    mean = jnp.mean(x1, axis=0, keepdims=True)
    var = jnp.mean(jnp.square(x1 - mean), axis=0, keepdims=True)
    scale = gamma_ref[...].astype(jnp.float32) * jax.lax.rsqrt(var + 1e-5)
    x1 = (x1 - mean) * scale + beta_ref[...].astype(jnp.float32)
    # GLU gate on the matching column slice of the resident x block.
    x_gate = x_ref[:, pl.ds(col, tn)].astype(jnp.float32)
    y = x_gate * jax.nn.sigmoid(x1)

    @pl.when(j == 0)
    def _():
        ss_sc[...] = jnp.zeros_like(ss_sc)

    y_sc[:, pl.ds(col, tn)] = y
    ss_sc[...] += jnp.sum(y * y, axis=1, keepdims=True)

    @pl.when(j == pl.num_programs(0) - 1)
    def _():
        inv = jax.lax.rsqrt(jnp.maximum(ss_sc[...], 1e-24))
        o_ref[...] = (y_sc[...] * inv).astype(o_ref.dtype)


def _cg_nobn_tiled_fused(x_ref, w_ref, b_ref, o_ref, y_sc, ss_sc):
    j = pl.program_id(0)
    tn = w_ref.shape[1]
    col = pl.multiple_of(j * tn, 128)

    x_mm = x_ref[...].astype(w_ref.dtype)
    x1 = jnp.dot(x_mm, w_ref[...], preferred_element_type=jnp.float32)
    x1 = x1 + b_ref[...].astype(jnp.float32)
    x_gate = x_ref[:, pl.ds(col, tn)].astype(jnp.float32)
    y = x_gate * jax.nn.sigmoid(x1)

    @pl.when(j == 0)
    def _():
        ss_sc[...] = jnp.zeros_like(ss_sc)

    y_sc[:, pl.ds(col, tn)] = y
    ss_sc[...] += jnp.sum(y * y, axis=1, keepdims=True)

    @pl.when(j == pl.num_programs(0) - 1)
    def _():
        inv = jax.lax.rsqrt(jnp.maximum(ss_sc[...], 1e-24))
        o_ref[...] = (y_sc[...] * inv).astype(o_ref.dtype)


# --------------------------------------------------------------------------
# One-time parameter prep (call OUTSIDE jit, once per set of weights).
# --------------------------------------------------------------------------
def prepare_params(w, b, gamma, beta, *, weight_dtype=None):
    """Transpose the PyTorch Linear weight [out, in] -> [in, out], optionally cast it
    (e.g. to bf16 for native MXU), and zero-pad the feature dim to a multiple of 128
    when the tiled path will be used. Do this once; never per forward call."""
    D = w.shape[0]
    dp128 = _round_up(D, 128)
    Dp = dp128 if dp128 >= _TILED_MIN_D else D
    w_t = jnp.swapaxes(w, 0, 1)
    if weight_dtype is not None:
        w_t = w_t.astype(weight_dtype)
    pad = Dp - D
    if pad:
        w_t = jnp.pad(w_t, ((0, pad), (0, pad)))
        b = jnp.pad(b, (0, pad))
        gamma = jnp.pad(gamma, (0, pad))
        beta = jnp.pad(beta, (0, pad))
    return w_t, b, gamma, beta


# --------------------------------------------------------------------------
# Forward wrapper
# --------------------------------------------------------------------------
@functools.partial(jax.jit, static_argnames=("use_bn", "tile_n"))
def mimic_ce_gated_embedding_unit(x, w_t, b, gamma, beta, *, use_bn=True, tile_n=None):
    """x: [B, D].  w_t/b/gamma/beta: outputs of prepare_params (w_t is [Dp, Dp],
    feature-padded to a multiple of 128 when Dp >= 512).  Returns [B, D]."""
    B, D = x.shape
    Dp = w_t.shape[0]
    assert w_t.shape == (Dp, Dp) and Dp >= D and Dp - D < 128

    use_tiled = (Dp % 128 == 0) and (Dp >= _TILED_MIN_D)

    if use_tiled:
        # --------------- column-tiled fused path ---------------
        pad = Dp - D
        x_p = jnp.pad(x, ((0, 0), (0, pad))) if pad else x

        w_bytes = jnp.dtype(w_t.dtype).itemsize
        if tile_n is None:
            tn = 128
            for cand in (1024, 512, 256, 128):
                if Dp % cand == 0 and 2 * Dp * cand * w_bytes <= _W_STREAM_BUDGET:
                    tn = cand
                    break
        else:
            tn = tile_n
        assert Dp % tn == 0 and tn % 128 == 0
        n_tiles = Dp // tn

        x_bytes = jnp.dtype(x.dtype).itemsize
        vmem_need = (2 * Dp * tn * w_bytes        # double-buffered W stream
                     + 2 * B * Dp * x_bytes       # resident x block
                     + 2 * B * Dp * x_bytes       # resident output block
                     + B * Dp * 4                 # y f32 scratch
                     + 6 * tn * 4                 # gamma/beta/bias row tiles
                     + (1 << 20))                 # ss scratch + slack
        vmem_limit = int(min(vmem_need + (4 << 20), 100 << 20))

        x_spec = pl.BlockSpec((B, Dp), lambda j: (0, 0))        # resident (DMA'd once)
        w_spec = pl.BlockSpec((Dp, tn), lambda j: (0, j))       # streamed per tile
        row_spec = pl.BlockSpec((1, tn), lambda j: (0, j))
        out_spec = pl.BlockSpec((B, Dp), lambda j: (0, 0))      # resident, stored at end
        scratch = [pltpu.VMEM((B, Dp), jnp.float32),            # y accumulator
                   pltpu.VMEM((B, 1), jnp.float32)]             # row sum-of-squares
        cparams = pltpu.CompilerParams(dimension_semantics=("arbitrary",),
                                       vmem_limit_bytes=vmem_limit)

        if use_bn:
            out_p = pl.pallas_call(
                _cg_bn_tiled_fused,
                out_shape=jax.ShapeDtypeStruct((B, Dp), x.dtype),
                grid=(n_tiles,),
                in_specs=[x_spec, w_spec, row_spec, row_spec],
                out_specs=out_spec,
                scratch_shapes=scratch,
                compiler_params=cparams,
            )(x_p, w_t, gamma.reshape(1, Dp), beta.reshape(1, Dp))
        else:
            out_p = pl.pallas_call(
                _cg_nobn_tiled_fused,
                out_shape=jax.ShapeDtypeStruct((B, Dp), x.dtype),
                grid=(n_tiles,),
                in_specs=[x_spec, w_spec, row_spec],
                out_specs=out_spec,
                scratch_shapes=scratch,
                compiler_params=cparams,
            )(x_p, w_t, b.reshape(1, Dp))
        return out_p if pad == 0 else out_p[:, :D]

    # --------------- single-block path (small D) ---------------
    full_spec = pl.BlockSpec((B, Dp), lambda: (0, 0))
    row_spec = pl.BlockSpec((1, Dp), lambda: (0, 0))
    w_spec = pl.BlockSpec((Dp, Dp), lambda: (0, 0))

    if use_bn:
        return pl.pallas_call(
            _cg_bn_kernel,
            out_shape=jax.ShapeDtypeStruct((B, Dp), x.dtype),
            grid=(),
            in_specs=[full_spec, w_spec, row_spec, row_spec],
            out_specs=full_spec,
        )(x, w_t, gamma.reshape(1, Dp), beta.reshape(1, Dp))
    else:
        return pl.pallas_call(
            _cg_nobn_kernel,
            out_shape=jax.ShapeDtypeStruct((B, Dp), x.dtype),
            grid=(),
            in_specs=[full_spec, w_spec, row_spec],
            out_specs=full_spec,
        )(x, w_t, b.reshape(1, Dp))


# --------------------------------------------------------------------------
# Pure-JAX reference (matches the PyTorch module forward, training-mode BN).
# --------------------------------------------------------------------------
def _reference(x, w, b, gamma, beta, use_bn):
    x1 = x @ w.T + b
    if use_bn:
        mean = x1.mean(0, keepdims=True)
        var = ((x1 - mean) ** 2).mean(0, keepdims=True)
        x1 = (x1 - mean) / jnp.sqrt(var + 1e-5) * gamma + beta
    y = x * jax.nn.sigmoid(x1)
    return y / jnp.maximum(jnp.linalg.norm(y, axis=1, keepdims=True), 1e-12)


if __name__ == "__main__":
    key = jax.random.PRNGKey(0)

    def make_case(key, B, D):
        k_x, k_w, k_b = jax.random.split(key, 3)
        x = jax.random.normal(k_x, (B, D), dtype=jnp.float32)
        bound = 1.0 / (D ** 0.5)
        w = jax.random.uniform(k_w, (D, D), minval=-bound, maxval=bound,
                               dtype=jnp.float32)
        b = jax.random.uniform(k_b, (D,), minval=-bound, maxval=bound,
                               dtype=jnp.float32)
        gamma = jnp.ones((D,), dtype=jnp.float32)
        beta = jnp.zeros((D,), dtype=jnp.float32)
        return x, w, b, gamma, beta

    cases = [
        # (name, B, D, use_bn, tile_n)
        ("bn_small",      8,  32, True,  None),   # single-block path
        ("nobn_small",    8,  32, False, None),   # single-block path, bias kept
        ("bn_tiled",      8, 512, True,  128),    # tiled fused path, 4 column tiles
        ("nobn_tiled",    8, 512, False, None),   # tiled fused path, auto TN (=512)
        ("bn_tiled_pad",  8, 600, True,  None),   # tiled fused path with 640 padding
    ]
    keys = jax.random.split(key, len(cases))

    ok = True
    for (name, B, D, use_bn, tn), k in zip(cases, keys):
        x, w, b, gamma, beta = make_case(k, B, D)
        # One-time param prep (transpose / pad) OUTSIDE the jitted forward.
        w_t, b_p, gamma_p, beta_p = prepare_params(w, b, gamma, beta)
        out = mimic_ce_gated_embedding_unit(x, w_t, b_p, gamma_p, beta_p,
                                            use_bn=use_bn, tile_n=tn)
        out = jax.block_until_ready(out)
        ref = _reference(x, w, b, gamma, beta, use_bn)
        if not jnp.allclose(out, ref, atol=1e-5, rtol=1e-5):
            ok = False
            print(f"MISMATCH in case {name}: "
                  f"max abs err = {float(jnp.max(jnp.abs(out - ref)))}")

    if ok:
        print("KERNEL_OK")
</pallas_src>

<mosaic_0001>
module attributes {stable_mosaic.version = 11 : i64} {
  func.func @_cg_bn_kernel(%arg0: memref<8x32xf32, #tpu.memory_space<vmem>>, %arg1: memref<32x32xf32, #tpu.memory_space<vmem>>, %arg2: memref<1x32xf32, #tpu.memory_space<vmem>>, %arg3: memref<1x32xf32, #tpu.memory_space<vmem>>, %arg4: memref<8x32xf32, #tpu.memory_space<vmem>>) attributes {dimension_semantics = [], scalar_prefetch = 0 : i64, scratch_operands = 0 : i64, tpu.core_type = #tpu.core_type<tc>} {
    %c0 = arith.constant 0 : index
    %c0_0 = arith.constant 0 : index
    %0 = vector.load %arg0[%c0, %c0_0] : memref<8x32xf32, #tpu.memory_space<vmem>>, vector<8x32xf32>
    %c0_1 = arith.constant 0 : index
    %c0_2 = arith.constant 0 : index
    %1 = vector.load %arg0[%c0_1, %c0_2] : memref<8x32xf32, #tpu.memory_space<vmem>>, vector<8x32xf32>
    %c0_3 = arith.constant 0 : index
    %c0_4 = arith.constant 0 : index
    %2 = vector.load %arg1[%c0_3, %c0_4] : memref<32x32xf32, #tpu.memory_space<vmem>>, vector<32x32xf32>
    %cst = arith.constant dense<0.000000e+00> : vector<8x32xf32>
    %3 = tpu.matmul %1, %2, %cst {dimension_numbers = #tpu.dot_dimension_numbers<[1], [0], [0], [1], [0, 0, 1, 1], [], []>} : vector<8x32xf32>, vector<32x32xf32>, vector<8x32xf32> -> vector<8x32xf32>
    %cst_5 = arith.constant dense<0.000000e+00> : vector<32xf32>
    %4 = vector.multi_reduction <add>, %3, %cst_5 [0] : vector<8x32xf32> to vector<32xf32>
    %5 = vector.shape_cast %4 : vector<32xf32> to vector<1x32xf32>
    %cst_6 = arith.constant 8.000000e+00 : f32
    %6 = vector.broadcast %cst_6 : f32 to vector<1x32xf32>
    %7 = arith.divf %5, %6 : vector<1x32xf32>
    %8 = vector.broadcast %7 : vector<1x32xf32> to vector<8x32xf32>
    %9 = arith.subf %3, %8 : vector<8x32xf32>
    %10 = arith.mulf %9, %9 : vector<8x32xf32>
    %cst_7 = arith.constant dense<0.000000e+00> : vector<32xf32>
    %11 = vector.multi_reduction <add>, %10, %cst_7 [0] : vector<8x32xf32> to vector<32xf32>
    %12 = vector.shape_cast %11 : vector<32xf32> to vector<1x32xf32>
    %cst_8 = arith.constant 8.000000e+00 : f32
    %13 = vector.broadcast %cst_8 : f32 to vector<1x32xf32>
    %14 = arith.divf %12, %13 : vector<1x32xf32>
    %c0_9 = arith.constant 0 : index
    %c0_10 = arith.constant 0 : index
    %15 = vector.load %arg2[%c0_9, %c0_10] : memref<1x32xf32, #tpu.memory_space<vmem>>, vector<1x32xf32>
    %cst_11 = arith.constant 9.99999974E-6 : f32
    %16 = vector.broadcast %cst_11 : f32 to vector<1x32xf32>
    %17 = arith.addf %14, %16 : vector<1x32xf32>
    %18 = math.rsqrt %17 : vector<1x32xf32>
    %19 = arith.mulf %15, %18 : vector<1x32xf32>
    %20 = vector.broadcast %7 : vector<1x32xf32> to vector<8x32xf32>
    %21 = arith.subf %3, %20 : vector<8x32xf32>
    %22 = vector.broadcast %19 : vector<1x32xf32> to vector<8x32xf32>
    %23 = arith.mulf %21, %22 : vector<8x32xf32>
    %c0_12 = arith.constant 0 : index
    %c0_13 = arith.constant 0 : index
    %24 = vector.load %arg3[%c0_12, %c0_13] : memref<1x32xf32, #tpu.memory_space<vmem>>, vector<1x32xf32>
    %25 = vector.broadcast %24 : vector<1x32xf32> to vector<8x32xf32>
    %26 = arith.addf %23, %25 : vector<8x32xf32>
    %27 = arith.negf %26 : vector<8x32xf32>
    %28 = math.exp %27 : vector<8x32xf32>
    %cst_14 = arith.constant 1.000000e+00 : f32
    %29 = vector.broadcast %cst_14 : f32 to vector<8x32xf32>
    %30 = arith.addf %29, %28 : vector<8x32xf32>
    %31 = arith.divf %29, %30 : vector<8x32xf32>
    %32 = arith.mulf %0, %31 : vector<8x32xf32>
    %33 = arith.mulf %32, %32 : vector<8x32xf32>
    %cst_15 = arith.constant dense<0.000000e+00> : vector<8xf32>
    %34 = vector.multi_reduction <add>, %33, %cst_15 [1] : vector<8x32xf32> to vector<8xf32>
    %35 = vector.shape_cast %34 : vector<8xf32> to vector<8x1xf32>
    %cst_16 = arith.constant 1.000000e-24 : f32
    %36 = vector.broadcast %cst_16 : f32 to vector<8x1xf32>
    %37 = arith.maximumf %35, %36 : vector<8x1xf32>
    %38 = math.rsqrt %37 : vector<8x1xf32>
    %39 = vector.broadcast %38 : vector<8x1xf32> to vector<8x32xf32>
    %40 = arith.mulf %32, %39 : vector<8x32xf32>
    %c0_17 = arith.constant 0 : index
    %c0_18 = arith.constant 0 : index
    %41 = vector.load %arg4[%c0_17, %c0_18] : memref<8x32xf32, #tpu.memory_space<vmem>>, vector<8x32xf32>
    tpu.vector_store %arg4[%c0_17, %c0_18], %40 {strides = array<i32>} : memref<8x32xf32, #tpu.memory_space<vmem>>, vector<8x32xf32>,
    return
  }
}

</mosaic_0001>

<bundles_post_ra>
// kernel: mimic_ce_gated_embedding_unit.1
= control target key start
LH: loop header
LB: loop body
LE: loop exit
PB: predicated region body
PF: predicated region fallthrough
CT: control target
= control target key end

     0   :  { %9 = vsyncpa [#allocation3], 0  ;;  %s344_s0 = inlined_call_operand.hbm [shape: f32[8,32], index: 0, kind: input, shape index: {}]   ;;  %s345_s1 = inlined_call_operand.hbm [shape: f32[32,32], index: 1, kind: input, shape index: {}]   ;;  %s346_s2 = inlined_call_operand.vmem [shape: f32[1,32], index: 2, kind: input, shape index: {}]   ;;  %s347_s3 = inlined_call_operand.vmem [shape: f32[1,32], index: 3, kind: input, shape index: {}]   ;;  %s348_s4 = inlined_call_operand.hbm [shape: f32[8,32], index: 4, kind: output, shape index: {}]  }
   0x1   :  { %10 = vsyncpa [#allocation6], 0 }
   0x2   :  { %11 = vsyncpa [#allocation4], 0  ;;  %s292_s15 = smov [#allocation2]   ;;  %s293_s17 = smov [#allocation5]  }
   0x3   :  { %s18_s16 = sshll.u32 %s292_s15, 4  ;;  %s27_s18 = sshll.u32 %s293_s17, 4  ;;  %s19_s16 = int_to_ptr.vmem [resolvable:$true] %s18_s16  ;;  %s28_s18 = int_to_ptr.vmem [resolvable:$true] %s27_s18 }
   0x4   :  { %s234_s19 = scalar_lea.vmem %s19_s16, 128  ;;  %p239_p1 = scmp.lt.s32.totalorder %s19_s16, %s19_s16 }
   0x5   :  { %p235_p0 = scmp.ne.s32.totalorder %s19_s16, %s234_s19  ;;  %p240_p2 = scmp.lt.s32.totalorder %s234_s19, %s234_s19 }
   0x7   :  { %p241_p3 = por %p240_p2, %p239_p1 }
   0x9   :  { %p242_p4 = pnand %p241_p3, %p235_p0 }
   0xb   :  { %245 = shalt.err (!%p242_p4)
}
   0xc   :  { %21 = dma.hbm_to_vmem [thread:$0]  %s344_s0, 128, %s19_s16, [#allocation3]  }
   0xd   :  { %s254_s22 = scalar_lea.vmem %s28_s18, 512  ;;  %p259_p6 = scmp.lt.s32.totalorder %s28_s18, %s28_s18 }
   0xe   :  { %p255_p5 = scmp.ne.s32.totalorder %s28_s18, %s254_s22  ;;  %p260_p7 = scmp.lt.s32.totalorder %s254_s22, %s254_s22 }
  0x10   :  { %p261_p8 = por %p260_p7, %p259_p6 }
  0x12   :  { %p262_p9 = pnand %p261_p8, %p255_p5 }
  0x14   :  { %265 = shalt.err (!%p262_p9)
}
  0x15   :  { %s294_s23 = smov 128   ;;  %s295_s24 = smov 8  }
  0x16   :  { %33 = dma.hbm_to_vmem [thread:$0]  %s345_s1, 512, %s28_s18, [#allocation6], %s294_s23, %s294_s23, %s295_s24  }
  0x17   :  { %286 = dma.done.wait [#allocation3], 128  }
  0x18   :  { %287 = vsyncadd [#allocation3], 4294967168 }
  0x19   :  { %288 = dma.done.wait [#allocation6], 512  }
  0x1a   :  { %289 = vsyncadd [#allocation6], 4294966784  ;;  %v296_v0 = vmov 0.0   ;;  %vm297_vm0 = vmmov 0   ;;  %v48_v1 = vld [vmem:[#allocation5 + $0x18] sm:$0xff]  ;;  %v47_v2 = vld [vmem:[#allocation5 + $0x10] sm:$0xff]  ;;  %v147_v27 = vlaneseq }
  0x1b   :  { %200 = vmatprep.subr.mxu0 %v296_v0  ;;  %208 = vmatprep.mubr.msk.f32.mxu0 %vm297_vm0, %v296_v0  ;;  %v46_v3 = vld [vmem:[#allocation5 + $0x8] sm:$0xff]  ;;  %v45_v4 = vld [vmem:[#allocation5] sm:$0xff]  ;;  %v44_v5 = vld [vmem:[#allocation2] sm:$0xff]  ;;  %vm49_vm1 = vcmask 261120  }
  0x1c   :  { %201 = vmatpush3.msra.mxu0 %v48_v1  ;;  %v148_v28 = vshrl.u32 %v147_v27, 7  ;;  %v142_v29 = vld [vmem:[%s346_s2] sm:$0x1]  ;;  %s298_s2 = smov [#allocation7]  }
  0x1d   :  { %202 = vmatprep.subr.mxu0 %v296_v0  ;;  %v193_v34 = vld [vmem:[%s347_s3] ss:$0 sm:$0xff]  ;;  %s182_s29 = sshll.u32 %s298_s2, 4  ;;  %s183_s29 = int_to_ptr.vmem [resolvable:$true] %s182_s29 }
  0x1e   :  { %203 = vmatpush3.msra.mxu0 %v47_v2  ;;  %v149_v30 = vsub.s32 0, %v148_v28  ;;  %s266_s3 = scalar_lea.vmem %s183_s29, 128  ;;  %p271_p11 = scmp.lt.s32.totalorder %s183_s29, %s183_s29 }
  0x1f   :  { %204 = vmatprep.subr.mxu0 %v296_v0  ;;  %p267_p10 = scmp.ne.s32.totalorder %s183_s29, %s266_s3  ;;  %p272_p12 = scmp.lt.s32.totalorder %s266_s3, %s266_s3 }
  0x20   :  { %205 = vmatpush3.msra.mxu0 %v46_v3 }
  0x21   :  { %206 = vmatprep.subr.mxu0 %v296_v0  ;;  %p273_p13 = por %p272_p12, %p271_p11 }
  0x22   :  { %207 = vmatpush3.msra.mxu0 %v45_v4 }
  0x23   :  { %209 = vmatmul.mubr.msk.f32.vlgmr.msra.gmra.mxu0 %vm49_vm1, %v44_v5  ;;  %p274_p0 = pnand %p273_p13, %p267_p10 }
  0xe3   :  { %v119_v6 = vpop.f32.mrf.mxu0 }
  0xe4   :  { %v123_v7 = vsel %vm49_vm1, %v119_v6, 0.0 }
  0xe5   :  { %v124_v8 = vrot.slane %v123_v7, 4  ;;  %v210_v9 = vpop.f32.mrf.mxu0 }
  0xe7   :  { %v125_v10 = vadd.f32 %v124_v8, %v123_v7 }
  0xe9   :  { %v126_v11 = vrot.slane %v125_v10, 2 }
  0xeb   :  { %v127_v12 = vadd.f32 %v126_v11, %v125_v10 }
  0xed   :  { %v128_v13 = vrot.slane %v127_v12, 1 }
  0xef   :  { %v129_v14 = vadd.f32 %v128_v13, %v127_v12 }
  0xf1   :  { %v131_v15 = vmul.f32 0.125, %v129_v14 }
  0xf3   :  { %v132_v16 = vsub.f32 %v119_v6, %v131_v15 }
  0xf5   :  { %v133_v17 = vmul.f32 %v132_v16, %v132_v16 }
  0xf7   :  { %v134_v18 = vsel %vm49_vm1, %v133_v17, 0.0 }
  0xf8   :  { %v135_v19 = vrot.slane %v134_v18, 4 }
  0xfa   :  { %v136_v20 = vadd.f32 %v135_v19, %v134_v18 }
  0xfc   :  { %v137_v21 = vrot.slane %v136_v20, 2 }
  0xfe   :  { %v138_v22 = vadd.f32 %v137_v21, %v136_v20 }
 0x100   :  { %v139_v23 = vrot.slane %v138_v22, 1 }
 0x102   :  { %v140_v24 = vadd.f32 %v139_v23, %v138_v22 }
 0x104   :  { %v141_v25 = vmul.f32 0.125, %v140_v24 }
 0x106   :  { %v143_v26 = vadd.f32 1e-05, %v141_v25 }
 0x108   :  { %218 = vrsqrt.f32 %v143_v26 }
 0x115   :  { %v219_v31 = vpop.eup %218 }
 0x116   :  { %v145_v32 = vmul.f32 %v219_v31, %v142_v29 }
 0x118   :  { %v150_v33 = vrot.slane %v145_v32, %v149_v30 }
 0x11a   :  { %v152_v35 = vmul.f32 %v150_v33, %v132_v16 }
 0x11c   :  { %v160_v36 = vadd.f32 %v193_v34, %v152_v35 }
 0x11e   :  { %v194_v37 = vmul.f32 -1.442695, %v160_v36 }
 0x120   :  { %220 = vpow2.f32 %v194_v37 }
 0x12d   :  { %v221_v38 = vpop.eup %220 }
 0x12e   :  { %v164_v39 = vadd.f32 1.0, %v221_v38 }
 0x130   :  { %222 = vrcp.f32 %v164_v39 }
 0x13d   :  { %v223_v40 = vpop.eup %222 }
 0x13e   :  { %v167_v41 = vmul.f32 %v223_v40, %v44_v5 }
 0x140   :  { %v168_v42 = vmul.f32 %v167_v41, %v167_v41 }
 0x142   :  { %v169_v43 = vsel %vm49_vm1, %v168_v42, 0.0 }
 0x143   :  { %170 = vadd.xlane.f32.xlu0 %v169_v43 }
 0x1cc   :  { %v171_v44 = vpop.xlane.xlu0 %170 }
 0x1cd   :  { %v172_v45 = vmax.f32 %v171_v44, 1e-24 }
 0x1cf   :  { %224 = vrsqrt.f32 %v172_v45 }
 0x1dc   :  { %v225_v46 = vpop.eup %224 }
 0x1dd   :  { %v174_v47 = vmul.f32 %v225_v46, %v167_v41 }
 0x1df   :  { %175 = vst.msk [vmem:[#allocation7] sm:$0xff] %vm49_vm1, %v174_v47 }
 0x1e0   :  { %277 = shalt.err (!%p274_p0)
}
 0x1e1   :  { %185 = dma.vmem_to_hbm [thread:$0]  %s183_s29, 128, %s348_s4, [#allocation4]  }
 0x1e2   :  { %290 = dma.done.wait [#allocation4], 128  }
 0x1e3   :  { %291 = vsyncadd [#allocation4], 4294967168 }
 0x1e4   :  { %189 = vsyncpa [#allocation3], 1 }
 0x1e5   :  { %190 = vsyncpa [#allocation6], 1 }
 0x1e6   :  { %191 = vsyncpa [#allocation4], 1 }

</bundles_post_ra>
